<compile_context>
chip_gen: v6e
topology: v6e:2x2x1
jax: 0.10.0
libtpu: 0.0.40
codegen_flags: <defaults>
</compile_context>

<pallas_src>
import functools
import math

import jax
import jax.numpy as jnp
from jax.experimental import pallas as pl
from jax.experimental.pallas import tpu as pltpu


def _layer_norm_kernel(x_ref, gamma_ref, beta_ref, out_ref, *, eps: float, d: int):
    # x_ref:     VMEM, (tn, D) native dtype -- one tile of rows
    # gamma_ref: VMEM, (1, D)  f32
    # beta_ref:  VMEM, (1, D)  f32
    # out_ref:   VMEM, (tn, D) native dtype
    x = x_ref[...].astype(jnp.float32)               # cast in-kernel, not in the wrapper
    mean = jnp.mean(x, axis=-1, keepdims=True)
    xc = x - mean
    # torch.Tensor.std default is the *unbiased* estimator (divide by D-1).
    var = jnp.sum(xc * xc, axis=-1, keepdims=True) * (1.0 / float(max(d - 1, 1)))
    std = jnp.sqrt(var)
    # Per-row reciprocal (tn,1): exact, so the 1e-5 reference tolerance holds; the
    # per-element op is now a single fused multiply-add instead of a divide.
    inv = 1.0 / (std + eps)
    out_ref[...] = (xc * (gamma_ref[...] * inv) + beta_ref[...]).astype(out_ref.dtype)


def _pick_row_tile(n: int, d: int, itemsize: int) -> int:
    """Largest useful row tile (multiple of 8) under a conservative VMEM budget."""
    # Budget covers: x double-buffered (2 bufs) + out double-buffered (2 bufs) in the
    # native dtype, plus ~2 tile-sized f32 temporaries inside the kernel.
    vmem_budget = 8 * 1024 * 1024          # stays well under v5e's 16 MiB default scoped VMEM
    bytes_per_row = d * (4 * itemsize + 8)
    tn = max(8, (vmem_budget // max(bytes_per_row, 1)) // 8 * 8)
    tn = min(tn, 1024)                      # diminishing returns beyond ~1024 rows (mem-bound)
    tn = min(tn, max(8, ((n + 7) // 8) * 8))  # don't exceed the (rounded-up) row count
    return int(tn)


def layer_norm_pallas(x, gamma, beta, eps: float = 1e-6):
    """LayerNorm with the module's semantics over the last axis of x (any leading dims)."""
    orig_shape = x.shape
    d = orig_shape[-1]
    n = int(math.prod(orig_shape[:-1]))
    x2 = x.reshape(n, d)                      # keep native dtype: half the HBM bytes for bf16
    itemsize = jnp.dtype(x2.dtype).itemsize

    tn = _pick_row_tile(n, d, itemsize)
    grid = (pl.cdiv(n, tn),)                  # ragged last block handled by Pallas (no pad/slice)

    gamma2 = gamma.reshape(1, d).astype(jnp.float32)
    beta2 = beta.reshape(1, d).astype(jnp.float32)

    # Advisory cost: ~1 read + 1 write of the activation, a handful of flops/elem, 1 sqrt/row.
    cost = pl.CostEstimate(
        flops=8 * n * d,
        transcendentals=n,
        bytes_accessed=2 * n * d * itemsize + 2 * d * 4,
    )

    # TODO(synk): if D is not a multiple of 128 (demo uses D=32), output stores are
    # lane-sparse (masked vst); real configs should keep d_model a multiple of 128.
    out = pl.pallas_call(
        functools.partial(_layer_norm_kernel, eps=eps, d=d),
        out_shape=jax.ShapeDtypeStruct((n, d), x2.dtype),
        grid=grid,
        in_specs=[
            pl.BlockSpec((tn, d), lambda i: (i, 0)),
            pl.BlockSpec((1, d), lambda i: (0, 0)),   # gamma: constant tiny block
            pl.BlockSpec((1, d), lambda i: (0, 0)),   # beta:  constant tiny block
        ],
        out_specs=pl.BlockSpec((tn, d), lambda i: (i, 0)),
        compiler_params=pltpu.CompilerParams(
            dimension_semantics=("parallel",),        # independent rows
        ),
        cost_estimate=cost,
    )(x2, gamma2, beta2)

    return out.reshape(orig_shape)


def decoder_forward(x, hidden_states, src_mask, tgt_mask, memory, layers, gamma, beta,
                    eps: float = 1e-6):
    """Mirrors Decoder.forward: run layers, collect attns, apply final LayerNorm."""
    # TODO(synk): the decoder sub-layer (self-attn / cross-attn / FFN) has no implementation
    # in the module spec ("layer" is an opaque constructor argument); layers are applied here
    # as opaque callables and only the final LayerNorm runs as a Pallas kernel. Once those
    # layers exist as Pallas kernels, fuse this LayerNorm as the last layer's epilogue.
    attns = []
    for layer in layers:
        x, attn = layer(x, hidden_states, src_mask, tgt_mask, memory)
        attns.append(attn)
    return layer_norm_pallas(x, gamma, beta, eps), attns


if __name__ == "__main__":
    # Small, module-consistent shapes: batch=2, seq=8, d_model=32, N=2 layers.
    B, S, D = 2, 8, 32
    n_layers = 2
    eps = 1e-6

    key = jax.random.PRNGKey(0)
    kx, kh, km, kg, kb = jax.random.split(key, 5)

    x = jax.random.normal(kx, (B, S, D), dtype=jnp.float32)
    hidden_states = jax.random.normal(kh, (B, S, D), dtype=jnp.float32)
    memory = jax.random.normal(km, (B, S, D), dtype=jnp.float32)
    src_mask = jnp.ones((B, 1, S), dtype=jnp.float32)
    tgt_mask = jnp.ones((B, S, S), dtype=jnp.float32)

    # LayerNorm params (default init is ones/zeros; perturbed so the check exercises them).
    gamma = jnp.ones((D,), jnp.float32) + 0.1 * jax.random.normal(kg, (D,), jnp.float32)
    beta = 0.1 * jax.random.normal(kb, (D,), jnp.float32)

    # Placeholder identity layers (sub-layer internals are not specified by the module).
    def make_layer():
        def layer(x, hidden_states, src_mask, tgt_mask, memory):
            attn = jnp.zeros((x.shape[0], x.shape[1], x.shape[1]), x.dtype)
            return x, attn
        return layer

    layers = [make_layer() for _ in range(n_layers)]

    out, attns = decoder_forward(x, hidden_states, src_mask, tgt_mask, memory,
                                 layers, gamma, beta, eps)
    out = jax.block_until_ready(out)

    # Pure-JAX reference (identity layers -> LayerNorm with torch's unbiased std).
    mean = x.mean(-1, keepdims=True)
    std = jnp.std(x, axis=-1, keepdims=True, ddof=1)
    ref = gamma * (x - mean) / (std + eps) + beta

    assert out.shape == (B, S, D)
    assert out.dtype == x.dtype
    assert len(attns) == n_layers
    assert jnp.allclose(out, ref, atol=1e-5, rtol=1e-5)

    print("KERNEL_OK")
</pallas_src>

<mosaic_0001>
module attributes {stable_mosaic.version = 11 : i64} {
  func.func @_layer_norm_kernel(%arg0: i32, %arg1: memref<16x32xf32, #tpu.memory_space<vmem>>, %arg2: memref<1x32xf32, #tpu.memory_space<vmem>>, %arg3: memref<1x32xf32, #tpu.memory_space<vmem>>, %arg4: memref<16x32xf32, #tpu.memory_space<vmem>>) attributes {dimension_semantics = [#tpu.dimension_semantics<parallel>], iteration_bounds = array<i64: 1>, scalar_prefetch = 0 : i64, scratch_operands = 0 : i64, tpu.core_type = #tpu.core_type<tc>, window_params = [{transform_indices = @transform_0, window_bounds = array<i64: 16, 32>}, {pipeline_mode = #tpu.pipeline_mode<synchronous>, transform_indices = @transform_1, window_bounds = array<i64: 1, 32>}, {pipeline_mode = #tpu.pipeline_mode<synchronous>, transform_indices = @transform_2, window_bounds = array<i64: 1, 32>}, {transform_indices = @transform_3, window_bounds = array<i64: 16, 32>}]} {
    %c0 = arith.constant 0 : index
    %c0_0 = arith.constant 0 : index
    %0 = vector.load %arg1[%c0, %c0_0] : memref<16x32xf32, #tpu.memory_space<vmem>>, vector<16x32xf32>
    %cst = arith.constant dense<0.000000e+00> : vector<16xf32>
    %1 = vector.multi_reduction <add>, %0, %cst [1] : vector<16x32xf32> to vector<16xf32>
    %2 = vector.shape_cast %1 : vector<16xf32> to vector<16x1xf32>
    %cst_1 = arith.constant 3.200000e+01 : f32
    %3 = vector.broadcast %cst_1 : f32 to vector<16x1xf32>
    %4 = arith.divf %2, %3 : vector<16x1xf32>
    %5 = vector.broadcast %4 : vector<16x1xf32> to vector<16x32xf32>
    %6 = arith.subf %0, %5 : vector<16x32xf32>
    %7 = arith.mulf %6, %6 : vector<16x32xf32>
    %cst_2 = arith.constant dense<0.000000e+00> : vector<16xf32>
    %8 = vector.multi_reduction <add>, %7, %cst_2 [1] : vector<16x32xf32> to vector<16xf32>
    %9 = vector.shape_cast %8 : vector<16xf32> to vector<16x1xf32>
    %cst_3 = arith.constant 0.0322580636 : f32
    %10 = vector.broadcast %cst_3 : f32 to vector<16x1xf32>
    %11 = arith.mulf %9, %10 : vector<16x1xf32>
    %12 = math.sqrt %11 : vector<16x1xf32>
    %cst_4 = arith.constant 9.99999997E-7 : f32
    %13 = vector.broadcast %cst_4 : f32 to vector<16x1xf32>
    %14 = arith.addf %12, %13 : vector<16x1xf32>
    %cst_5 = arith.constant 1.000000e+00 : f32
    %15 = vector.broadcast %cst_5 : f32 to vector<16x1xf32>
    %16 = arith.divf %15, %14 : vector<16x1xf32>
    %c0_6 = arith.constant 0 : index
    %c0_7 = arith.constant 0 : index
    %17 = vector.load %arg2[%c0_6, %c0_7] : memref<1x32xf32, #tpu.memory_space<vmem>>, vector<1x32xf32>
    %18 = vector.broadcast %17 : vector<1x32xf32> to vector<16x32xf32>
    %19 = vector.broadcast %16 : vector<16x1xf32> to vector<16x32xf32>
    %20 = arith.mulf %18, %19 : vector<16x32xf32>
    %21 = arith.mulf %6, %20 : vector<16x32xf32>
    %c0_8 = arith.constant 0 : index
    %c0_9 = arith.constant 0 : index
    %22 = vector.load %arg3[%c0_8, %c0_9] : memref<1x32xf32, #tpu.memory_space<vmem>>, vector<1x32xf32>
    %23 = vector.broadcast %22 : vector<1x32xf32> to vector<16x32xf32>
    %24 = arith.addf %21, %23 : vector<16x32xf32>
    %c0_10 = arith.constant 0 : index
    %c0_11 = arith.constant 0 : index
    %25 = vector.load %arg4[%c0_10, %c0_11] : memref<16x32xf32, #tpu.memory_space<vmem>>, vector<16x32xf32>
    tpu.vector_store %arg4[%c0_10, %c0_11], %24 {strides = array<i32>} : memref<16x32xf32, #tpu.memory_space<vmem>>, vector<16x32xf32>,
    return
  }
  func.func @transform_0(%arg0: i32) -> (i32, i32) {
    %c0_i32 = arith.constant 0 : i32
    %c0_i32_0 = arith.constant 0 : i32
    return %arg0, %c0_i32 : i32, i32
  }
  func.func @transform_1(%arg0: i32) -> (i32, i32) {
    %c0_i32 = arith.constant 0 : i32
    %c0_i32_0 = arith.constant 0 : i32
    %c0_i32_1 = arith.constant 0 : i32
    return %c0_i32, %c0_i32_0 : i32, i32
  }
  func.func @transform_2(%arg0: i32) -> (i32, i32) {
    %c0_i32 = arith.constant 0 : i32
    %c0_i32_0 = arith.constant 0 : i32
    %c0_i32_1 = arith.constant 0 : i32
    return %c0_i32, %c0_i32_0 : i32, i32
  }
  func.func @transform_3(%arg0: i32) -> (i32, i32) {
    %c0_i32 = arith.constant 0 : i32
    %c0_i32_0 = arith.constant 0 : i32
    return %arg0, %c0_i32 : i32, i32
  }
}

</mosaic_0001>

<bundles_post_ra>
// kernel: tpu_custom_call.1
= control target key start
LH: loop header
LB: loop body
LE: loop exit
PB: predicated region body
PF: predicated region fallthrough
CT: control target
= control target key end

     0   :  { %8 = vsyncpa [#allocation3], 0  ;;  %s218_s0 = inlined_call_operand.hbm [shape: f32[16,32], index: 0, kind: input, shape index: {}]   ;;  %s219_s1 = inlined_call_operand.vmem [shape: f32[1,32], index: 1, kind: input, shape index: {}]   ;;  %s220_s2 = inlined_call_operand.vmem [shape: f32[1,32], index: 2, kind: input, shape index: {}]   ;;  %s221_s3 = inlined_call_operand.hbm [shape: f32[16,32], index: 3, kind: output, shape index: {}]  }
   0x1   :  { %9 = vsyncpa [#allocation4], 0  ;;  %s170_s12 = smov [#allocation2]  }
   0x2   :  { %s15_s13 = sshll.u32 %s170_s12, 4  ;;  %s16_s13 = int_to_ptr.vmem [resolvable:$true] %s15_s13 }
   0x3   :  { %s134_s14 = scalar_lea.vmem %s16_s13, 256  ;;  %p139_p1 = scmp.lt.s32.totalorder %s16_s13, %s16_s13 }
   0x4   :  { %p135_p0 = scmp.ne.s32.totalorder %s16_s13, %s134_s14  ;;  %p140_p2 = scmp.lt.s32.totalorder %s134_s14, %s134_s14 }
   0x6   :  { %p141_p3 = por %p140_p2, %p139_p1 }
   0x8   :  { %p142_p4 = pnand %p141_p3, %p135_p0 }
   0xa   :  { %145 = shalt.err (!%p142_p4)
}
   0xb   :  { %s171_s15 = smov 128   ;;  %s172_s16 = smov 8  }
   0xc   :  { %21 = dma.hbm_to_vmem [thread:$0]  %s218_s0, 256, %s16_s13, [#allocation3], %s171_s15, %s171_s15, %s172_s16  }
   0xd   :  { %166 = dma.done.wait [#allocation3], 256  }
   0xe   :  { %167 = vsyncadd [#allocation3], 4294967040  ;;  %vm31_vm0 = vcmask 261120   ;;  %v29_v0 = vld [vmem:[#allocation2] sm:$0xff]  ;;  %v30_v1 = vld [vmem:[#allocation2 + $0x8] sm:$0xff]  ;;  %s173_s22 = smov [#allocation5]  }
   0xf   :  { %v32_v2 = vsel %vm31_vm0, %v29_v0, 0.0  ;;  %v35_v3 = vsel %vm31_vm0, %v30_v1, 0.0  ;;  %v112_v30 = vld [vmem:[%s219_s1] ss:$0 sm:$0xff]  ;;  %s100_s23 = sshll.u32 %s173_s22, 4  ;;  %s101_s23 = int_to_ptr.vmem [resolvable:$true] %s100_s23 }
  0x10   :  { %33 = vadd.xlane.f32.xlu0 %v32_v2  ;;  %v113_v33 = vld [vmem:[%s220_s2] ss:$0 sm:$0xff]  ;;  %s146_s1 = scalar_lea.vmem %s101_s23, 256  ;;  %p151_p6 = scmp.lt.s32.totalorder %s101_s23, %s101_s23 }
  0x11   :  { %p147_p5 = scmp.ne.s32.totalorder %s101_s23, %s146_s1  ;;  %p152_p7 = scmp.lt.s32.totalorder %s146_s1, %s146_s1 }
  0x13   :  { %p153_p8 = por %p152_p7, %p151_p6 }
  0x14   :  { %36 = vadd.xlane.f32.xlu0 %v35_v3 }
  0x15   :  { %p154_p9 = pnand %p153_p8, %p147_p5 }
  0x99   :  { %v34_v4 = vpop.xlane.xlu0 %33 }
  0x9a   :  { %v39_v5 = vmul.f32 0.03125, %v34_v4 }
  0x9c   :  { %v41_v6 = vsub.f32 %v29_v0, %v39_v5 }
  0x9d   :  { %v37_v7 = vpop.xlane.xlu0 %36 }
  0x9e   :  { %v40_v8 = vmul.f32 0.03125, %v37_v7  ;;  %v43_v9 = vmul.f32 %v41_v6, %v41_v6 }
  0xa0   :  { %v42_v10 = vsub.f32 %v30_v1, %v40_v8  ;;  %v45_v11 = vsel %vm31_vm0, %v43_v9, 0.0 }
  0xa1   :  { %46 = vadd.xlane.f32.xlu1 %v45_v11 }
  0xa2   :  { %v44_v12 = vmul.f32 %v42_v10, %v42_v10 }
  0xa4   :  { %v48_v13 = vsel %vm31_vm0, %v44_v12, 0.0 }
  0xa5   :  { %49 = vadd.xlane.f32.xlu1 %v48_v13 }
 0x12a   :  { %v47_v14 = vpop.xlane.xlu1 %46 }
 0x12b   :  { %v51_v15 = vmul.f32 0.032258064, %v47_v14 }
 0x12d   :  { %118 = vrsqrt.f32 %v51_v15  ;;  %vm55_vm1 = vcmp.eq.f32.partialorder %v51_v15, inf  ;;  %v58_v20 = vand.u32 2147483648, %v51_v15  ;;  %vm57_vm2 = vcmp.eq.f32.partialorder %v51_v15, 0.0 }
 0x12e   :  { %v50_v16 = vpop.xlane.xlu1 %49 }
 0x12f   :  { %v52_v17 = vmul.f32 0.032258064, %v50_v16 }
 0x131   :  { %120 = vrsqrt.f32 %v52_v17  ;;  %vm62_vm3 = vcmp.eq.f32.partialorder %v52_v17, inf  ;;  %v65_v26 = vand.u32 2147483648, %v52_v17  ;;  %vm64_vm4 = vcmp.eq.f32.partialorder %v52_v17, 0.0 }
 0x13a   :  { %v119_v18 = vpop.eup %118 }
 0x13b   :  { %v54_v19 = vmul.f32 %v119_v18, %v51_v15 }
 0x13d   :  { %v56_v21 = vsel %vm55_vm1, %v51_v15, %v54_v19 }
 0x13e   :  { %v121_v22 = vpop.eup %120  ;;  %v59_v23 = vsel %vm57_vm2, %v58_v20, %v56_v21 }
 0x13f   :  { %v67_v24 = vadd.f32 1e-06, %v59_v23  ;;  %v61_v25 = vmul.f32 %v121_v22, %v52_v17 }
 0x141   :  { %122 = vrcp.f32 %v67_v24  ;;  %v63_v27 = vsel %vm62_vm3, %v52_v17, %v61_v25 }
 0x142   :  { %v66_v28 = vsel %vm64_vm4, %v65_v26, %v63_v27 }
 0x143   :  { %v68_v29 = vadd.f32 1e-06, %v66_v28 }
 0x145   :  { %124 = vrcp.f32 %v68_v29 }
 0x14e   :  { %v123_v31 = vpop.eup %122 }
 0x14f   :  { %v80_v32 = vmul.f32 %v123_v31, %v112_v30 }
 0x151   :  { %v82_v34 = vmul.f32 %v80_v32, %v41_v6 }
 0x152   :  { %v125_v35 = vpop.eup %124 }
 0x153   :  { %v81_v36 = vmul.f32 %v125_v35, %v112_v30  ;;  %v91_v37 = vadd.f32 %v113_v33, %v82_v34 }
 0x155   :  { %v83_v38 = vmul.f32 %v81_v36, %v42_v10  ;;  %93 = vst.msk [vmem:[#allocation5] sm:$0xff] %vm31_vm0, %v91_v37 }
 0x157   :  { %v92_v39 = vadd.f32 %v113_v33, %v83_v38 }
 0x159   :  { %94 = vst.msk [vmem:[#allocation5 + $0x8] sm:$0xff] %vm31_vm0, %v92_v39 }
 0x15a   :  { %157 = shalt.err (!%p154_p9)
}
 0x15b   :  { %106 = dma.vmem_to_hbm [thread:$0]  %s101_s23, 256, %s221_s3, [#allocation4], %s171_s15, %s171_s15, %s172_s16  }
 0x15c   :  { %168 = dma.done.wait [#allocation4], 256  }
 0x15d   :  { %169 = vsyncadd [#allocation4], 4294967040 }
 0x15e   :  { %110 = vsyncpa [#allocation3], 1 }
 0x15f   :  { %111 = vsyncpa [#allocation4], 1 }

</bundles_post_ra>
